<compile_context>
chip_gen: v7x
topology: tpu7x:2x2x1
jax: 0.10.0
libtpu: 0.0.40
codegen_flags: <defaults>
</compile_context>

<pallas_src>
import functools
import math

import jax
import jax.numpy as jnp
from jax import lax
from jax.experimental import pallas as pl
from jax.experimental.pallas import tpu as pltpu

block_size = 32
n_embd = 32
dropout_p = 0.2  # unused (eval-mode)


def _head_kernel(x_ref, w_ref, o_ref, *, head_size, mxu_dtype):
    # x_ref: (Bb, T, C)   Bb batch elements per grid step
    # w_ref: (C, 3H)      fused [Wk | (Wq/sqrt(H)) | Wv] (pre-transposed)
    # o_ref: (Bb, T, H)
    Bb, T, C = x_ref.shape
    H = head_size

    x = x_ref[...]
    w = w_ref[...]

    # Fused QKV projection: one matmul over the flattened rows. MXU operands may
    # be bf16 (v6e/v7x fast path); accumulation stays f32.
    x2 = x.reshape(Bb * T, C).astype(mxu_dtype)           # merge of major dims: free
    qkv = jnp.dot(x2, w.astype(mxu_dtype),
                  preferred_element_type=jnp.float32)      # (Bb*T, 3H) f32
    qkv = qkv.reshape(Bb, T, 3 * H)
    k = qkv[:, :, 0:H]                                     # (Bb, T, H)
    q = qkv[:, :, H:2 * H]                                 # already scaled by 1/sqrt(H)
    v = qkv[:, :, 2 * H:3 * H]

    # Attention scores, NT-style batched matmul (no explicit transpose / XLU).
    wei = lax.dot_general(
        q.astype(mxu_dtype), k.astype(mxu_dtype),
        dimension_numbers=(((2,), (2,)), ((0,), (0,))),
        preferred_element_type=jnp.float32)                # (Bb, T, T)

    # Causal mask from a single (1,T,T) iota comparison; broadcasts over Bb.
    row = lax.broadcasted_iota(jnp.int32, (1, T, T), 1)
    col = lax.broadcasted_iota(jnp.int32, (1, T, T), 2)
    wei = jnp.where(col <= row, wei, -jnp.inf)

    # Numerically-stable softmax; normalization deferred until after p @ v so the
    # reciprocal/multiply act on (Bb,T,H) instead of (Bb,T,T).
    wei_max = jnp.max(wei, axis=-1, keepdims=True)
    e = jnp.exp(wei - wei_max)                             # (Bb, T, T), in [0,1]
    denom = jnp.sum(e, axis=-1, keepdims=True)             # (Bb, T, 1)

    out = lax.dot_general(
        e.astype(mxu_dtype), v.astype(mxu_dtype),
        dimension_numbers=(((2,), (1,)), ((0,), (0,))),
        preferred_element_type=jnp.float32)                # (Bb, T, H)
    out = out * pl.reciprocal(denom, approx=False)         # exact -> tight accuracy

    o_ref[...] = out.astype(o_ref.dtype)


def head_forward(x, w_key, w_query, w_value, *, batch_block=None,
                 mxu_dtype=jnp.float32):
    """Pallas equivalent of Head.forward (eval mode).

    x:                  (B, T, C) float32
    w_key/query/value:  PyTorch-style Linear weights, shape (head_size, n_embd)
    mxu_dtype:          operand dtype for the MXU matmuls (f32 exact, bf16 fast
                        path on v6e/v7x; accumulation is always f32)
    returns:            (B, T, head_size) float32
    """
    B, T, C = x.shape
    H = w_key.shape[0]

    # Fuse the three Linear weights into a single (C, 3H) matrix; fold the
    # 1/sqrt(H) attention scale into the query columns.
    scale = 1.0 / math.sqrt(H)
    w_qkv = jnp.concatenate(
        [jnp.asarray(w_key).T,
         jnp.asarray(w_query).T * scale,
         jnp.asarray(w_value).T],
        axis=1).astype(jnp.float32)                        # (C, 3H)

    # --- generation-aware VMEM / grid heuristics ---
    try:
        info = pltpu.get_tpu_info()
        vmem_capacity = int(getattr(info, "vmem_capacity_bytes",
                                    64 * 1024 * 1024))
    except Exception:  # interpret mode / no TPU info available
        vmem_capacity = 64 * 1024 * 1024                   # v7x physical (smallest)

    # Per-batch-element per-step bytes: double-buffered x + out tiles, PLUS the
    # f32 qkv / (T,T) score + exp / f32-out intermediates live inside the step.
    per_batch_bytes = (2 * T * (C + H) * 4                 # pipelined x + out tiles
                       + T * 3 * H * 4                     # qkv
                       + 3 * T * T * 4                     # scores, exp, where temp
                       + T * H * 4)                        # f32 out before store
    fixed_bytes = 2 * C * 3 * H * 4                        # (C,3H) weight, dbl-buffered
    vmem_budget = vmem_capacity // 4                       # headroom for 2 TCs + bufs

    if batch_block is None:
        rows_target = 512                                  # ~85% of HBM roofline
        bb = max(1, rows_target // max(T, 1))
        bb = min(bb, max(1, (vmem_budget - fixed_bytes) // per_batch_bytes))
        if B >= 4:
            bb = min(bb, B // 4)                           # >=4 steps: both v7x TCs pipelined
        bb = max(1, min(bb, B))
        while B % bb:                                      # divisor of B -> no padding
            bb -= 1
        batch_block = bb
    batch_block = max(1, min(batch_block, B))
    assert B % batch_block == 0, "batch_block must divide B"
    num_blocks = B // batch_block

    vmem_limit = int(min(max(vmem_capacity // 2, 32 * 1024 * 1024),
                         max(32 * 1024 * 1024,
                             2 * (fixed_bytes + batch_block * per_batch_bytes))))

    kernel = functools.partial(_head_kernel, head_size=H, mxu_dtype=mxu_dtype)

    out = pl.pallas_call(
        kernel,
        out_shape=jax.ShapeDtypeStruct((B, T, H), jnp.float32),
        grid_spec=pltpu.PrefetchScalarGridSpec(
            num_scalar_prefetch=0,
            grid=(num_blocks,),
            in_specs=[
                pl.BlockSpec((batch_block, T, C), lambda i: (i, 0, 0)),
                # Same (0, 0) block every step -> Pallas skips redundant DMAs.
                pl.BlockSpec((C, 3 * H), lambda i: (0, 0)),
            ],
            out_specs=pl.BlockSpec((batch_block, T, H), lambda i: (i, 0, 0)),
        ),
        compiler_params=pltpu.CompilerParams(
            dimension_semantics=("parallel",),
            vmem_limit_bytes=vmem_limit),
    )(x, w_qkv)

    return out


def _reference(x, w_key, w_query, w_value):
    # pure-JAX reference mirroring the torch code (eval mode, no dropout)
    H = w_key.shape[0]
    k = x @ w_key.T
    q = x @ w_query.T
    v = x @ w_value.T
    wei = (q @ jnp.swapaxes(k, -2, -1)) / math.sqrt(H)
    T = x.shape[1]
    mask = jnp.tril(jnp.ones((T, T)))
    wei = jnp.where(mask == 0, -jnp.inf, wei)
    wei = jax.nn.softmax(wei, axis=-1)
    return wei @ v


if __name__ == "__main__":
    B, T, C = 16, block_size, n_embd   # T == block_size; multiple grid steps
    head_size = 16

    key = jax.random.PRNGKey(0)
    kx, kk, kq, kv = jax.random.split(key, 4)

    x = jax.random.normal(kx, (B, T, C), dtype=jnp.float32)
    # deterministic "Linear" weights, PyTorch layout (head_size, n_embd)
    bound = 1.0 / math.sqrt(n_embd)
    w_key = jax.random.uniform(kk, (head_size, n_embd), jnp.float32, -bound, bound)
    w_query = jax.random.uniform(kq, (head_size, n_embd), jnp.float32, -bound, bound)
    w_value = jax.random.uniform(kv, (head_size, n_embd), jnp.float32, -bound, bound)

    ref = _reference(x, w_key, w_query, w_value)

    # 1) f32 MXU operands: exact-path check (tight tolerance).
    out = jax.block_until_ready(head_forward(x, w_key, w_query, w_value))
    assert out.shape == (B, T, head_size)
    max_err = float(jnp.max(jnp.abs(out - ref)))
    assert jnp.allclose(out, ref, atol=1e-4, rtol=1e-4), (
        f"f32 mismatch vs reference (max abs err {max_err:.2e})")

    # 2) bf16 MXU operands (v6e/v7x fast path), f32 accumulation: loose tolerance
    #    covers bf16 operand rounding only.
    out_bf16 = jax.block_until_ready(
        head_forward(x, w_key, w_query, w_value, mxu_dtype=jnp.bfloat16))
    max_err_bf16 = float(jnp.max(jnp.abs(out_bf16 - ref)))
    assert jnp.allclose(out_bf16, ref, atol=5e-2, rtol=5e-2), (
        f"bf16 mismatch vs reference (max abs err {max_err_bf16:.2e})")

    print("KERNEL_OK")
</pallas_src>

<mosaic_0001>
module attributes {stable_mosaic.version = 11 : i64} {
  func.func @_head_kernel(%arg0: i32, %arg1: memref<4x32x32xf32, #tpu.memory_space<vmem>>, %arg2: memref<32x48xf32, #tpu.memory_space<vmem>>, %arg3: memref<4x32x16xf32, #tpu.memory_space<vmem>>) attributes {dimension_semantics = [#tpu.dimension_semantics<parallel>], iteration_bounds = array<i64: 4>, scalar_prefetch = 0 : i64, scratch_operands = 0 : i64, tpu.core_type = #tpu.core_type<tc>, window_params = [{transform_indices = @transform_0, window_bounds = array<i64: 4, 32, 32>}, {pipeline_mode = #tpu.pipeline_mode<synchronous>, transform_indices = @transform_1, window_bounds = array<i64: 32, 48>}, {transform_indices = @transform_2, window_bounds = array<i64: 4, 32, 16>}]} {
    %c0 = arith.constant 0 : index
    %c0_0 = arith.constant 0 : index
    %c0_1 = arith.constant 0 : index
    %0 = vector.load %arg1[%c0, %c0_0, %c0_1] : memref<4x32x32xf32, #tpu.memory_space<vmem>>, vector<4x32x32xf32>
    %c0_2 = arith.constant 0 : index
    %c0_3 = arith.constant 0 : index
    %1 = vector.load %arg2[%c0_2, %c0_3] : memref<32x48xf32, #tpu.memory_space<vmem>>, vector<32x48xf32>
    %2 = vector.shape_cast %0 : vector<4x32x32xf32> to vector<128x32xf32>
    %cst = arith.constant dense<0.000000e+00> : vector<128x48xf32>
    %3 = tpu.matmul %2, %1, %cst {dimension_numbers = #tpu.dot_dimension_numbers<[1], [0], [0], [1], [0, 0, 1, 1], [], []>} : vector<128x32xf32>, vector<32x48xf32>, vector<128x48xf32> -> vector<128x48xf32>
    %4 = vector.shape_cast %3 : vector<128x48xf32> to vector<4x32x48xf32>
    %5 = vector.extract_strided_slice %4 {offsets = [0, 0, 0], sizes = [4, 32, 16], strides = [1, 1, 1]} : vector<4x32x48xf32> to vector<4x32x16xf32>
    %6 = vector.extract_strided_slice %4 {offsets = [0, 0, 16], sizes = [4, 32, 16], strides = [1, 1, 1]} : vector<4x32x48xf32> to vector<4x32x16xf32>
    %7 = vector.extract_strided_slice %4 {offsets = [0, 0, 32], sizes = [4, 32, 16], strides = [1, 1, 1]} : vector<4x32x48xf32> to vector<4x32x16xf32>
    %cst_4 = arith.constant dense<0.000000e+00> : vector<4x32x32xf32>
    %8 = tpu.matmul %6, %5, %cst_4 {dimension_numbers = #tpu.dot_dimension_numbers<[2], [2], [1], [1], [0, 0, 0, 1, 1, 1], [0], [0]>} : vector<4x32x16xf32>, vector<4x32x16xf32>, vector<4x32x32xf32> -> vector<4x32x32xf32>
    %9 = tpu.iota {dimensions = array<i32: 1>} : vector<1x32x32xi32>
    %10 = tpu.iota {dimensions = array<i32: 2>} : vector<1x32x32xi32>
    %11 = arith.cmpi sle, %10, %9 : vector<1x32x32xi32>
    %cst_5 = arith.constant 0xFF800000 : f32
    %12 = vector.shape_cast %11 : vector<1x32x32xi1> to vector<1x32x32xi1>
    %13 = vector.broadcast %12 : vector<1x32x32xi1> to vector<4x32x32xi1>
    %14 = vector.broadcast %cst_5 : f32 to vector<4x32x32xf32>
    %15 = arith.select %13, %8, %14 : vector<4x32x32xi1>, vector<4x32x32xf32>
    %cst_6 = arith.constant dense<0xFF800000> : vector<4x32xf32>
    %16 = vector.multi_reduction <maximumf>, %15, %cst_6 [2] : vector<4x32x32xf32> to vector<4x32xf32>
    %17 = vector.shape_cast %16 : vector<4x32xf32> to vector<4x32x1xf32>
    %18 = vector.broadcast %17 : vector<4x32x1xf32> to vector<4x32x32xf32>
    %19 = arith.subf %15, %18 : vector<4x32x32xf32>
    %20 = math.exp %19 : vector<4x32x32xf32>
    %cst_7 = arith.constant dense<0.000000e+00> : vector<4x32xf32>
    %21 = vector.multi_reduction <add>, %20, %cst_7 [2] : vector<4x32x32xf32> to vector<4x32xf32>
    %22 = vector.shape_cast %21 : vector<4x32xf32> to vector<4x32x1xf32>
    %cst_8 = arith.constant dense<0.000000e+00> : vector<4x32x16xf32>
    %23 = tpu.matmul %20, %7, %cst_8 {dimension_numbers = #tpu.dot_dimension_numbers<[2], [1], [1], [2], [0, 0, 0, 1, 1, 2], [0], [0]>} : vector<4x32x32xf32>, vector<4x32x16xf32>, vector<4x32x16xf32> -> vector<4x32x16xf32>
    %24 = tpu.reciprocal %22 : vector<4x32x1xf32> -> vector<4x32x1xf32>
    %25 = vector.broadcast %24 : vector<4x32x1xf32> to vector<4x32x16xf32>
    %26 = arith.mulf %23, %25 : vector<4x32x16xf32>
    %c0_9 = arith.constant 0 : index
    %c0_10 = arith.constant 0 : index
    %c0_11 = arith.constant 0 : index
    %27 = vector.load %arg3[%c0_9, %c0_10, %c0_11] : memref<4x32x16xf32, #tpu.memory_space<vmem>>, vector<4x32x16xf32>
    tpu.vector_store %arg3[%c0_9, %c0_10, %c0_11], %26 {strides = array<i32>} : memref<4x32x16xf32, #tpu.memory_space<vmem>>, vector<4x32x16xf32>,
    return
  }
  func.func @transform_0(%arg0: i32) -> (i32, i32, i32) {
    %c0_i32 = arith.constant 0 : i32
    %c0_i32_0 = arith.constant 0 : i32
    %c0_i32_1 = arith.constant 0 : i32
    return %arg0, %c0_i32, %c0_i32_0 : i32, i32, i32
  }
  func.func @transform_1(%arg0: i32) -> (i32, i32) {
    %c0_i32 = arith.constant 0 : i32
    %c0_i32_0 = arith.constant 0 : i32
    %c0_i32_1 = arith.constant 0 : i32
    return %c0_i32, %c0_i32_0 : i32, i32
  }
  func.func @transform_2(%arg0: i32) -> (i32, i32, i32) {
    %c0_i32 = arith.constant 0 : i32
    %c0_i32_0 = arith.constant 0 : i32
    %c0_i32_1 = arith.constant 0 : i32
    return %arg0, %c0_i32, %c0_i32_0 : i32, i32, i32
  }
}

</mosaic_0001>

<bundles_post_ra>
// kernel: tpu_custom_call.1
= control target key start
LH: loop header
LB: loop body
LE: loop exit
PB: predicated region body
PF: predicated region fallthrough
CT: control target
= control target key end

     0   :  { %7 = vsyncpa [#allocation3], 0  ;;  %s2751_s0 = inlined_call_operand.hbm [shape: f32[16,32,32], index: 0, kind: input, shape index: {}]   ;;  %s2752_s1 = inlined_call_operand.hbm [shape: f32[32,48], index: 1, kind: input, shape index: {}]   ;;  %s2753_s2 = inlined_call_operand.vmem [shape: f32[16,32,16], index: 2, kind: output, shape index: {}]  }
   0x1   :  { %9 = vsyncpa [#allocation3 + $0x1], 0 }
   0x2   :  { %10 = vsyncpa [#allocation5], 0  ;;  %s2274_s9 = smov 0   ;;  %s2276_s10 = smov 0  }
   0x3   :  { %s2278_s11 = smov 0   ;;  %s2280_s12 = smov 0  }
   0x4 LB: > { %s1593_s13 = sadd.s32 4294967295, %s2251_s12   ;;  %p36_p0 = scmp.ne.s32.totalorder %s2243_s10, %s2239_s9  ;;  %s2251_s12 = sphi %s2280_s12, %s2771_s12   ;;  %s2247_s11 = sphi %s2278_s11, %s2770_s11   ;;  %s2243_s10 = sphi %s2276_s10, %s2769_s10   ;;  %s2239_s9 = sphi %s2274_s9, %s2768_s9  }
   0x5   : > { %p2296_p1 = scmp.eq.s32.totalorder %s1593_s13, 0  ;;  %p1595_p2 = scmp.ge.s32.totalorder %s2251_s12, 1 }
   0x6   : > { %p94_p3 = scmp.lt.s32.totalorder %s2251_s12, 5  ;;  %s2253_s17 = smov [#allocation4]  }
   0x7   : > { %s2758_s14 = scalar_select %p2296_p1, 1, 0 }
   0x8   : > { %p2304_p4 = por %p2296_p1, %p36_p0  ;;  %p2308_p5 = pnand %p1595_p2, %p94_p3 }
   0x9   : > { %s106_s18 = sshll.u32 %s2253_s17, 4  ;;  %s2321_s20 = sadd.s32 1, %s2251_s12   ;;  %s107_s18 = int_to_ptr.vmem [resolvable:$true] %s106_s18 }
   0xa   : > { %s2759_s15 = scalar_select %p2304_p4, 1, 0 }
   0xb   : > { %s2760_s16 = scalar_select %p2308_p5, 1, 0 }
   0xc   : > { %p2003_p6 = pneg %p2308_p5  ;;  %s23_s21 = sadd.s32 1, %s2247_s11 }
   0xd   : > { %s20_s22 = ssub.s32 %s2251_s12, %s2321_s20  ;;  %s2155_s25 = scalar_lea.hbm %s2752_s1, 512 }
   0xe   : > { %p2316_p7 = pnand %p2003_p6, %p2296_p1  ;;  %p2156_p8 = scmp.ne.s32.totalorder %s2752_s1, %s2155_s25 }
   0xf   : > { %p2162_p12 = scmp.lt.u32.totalorder %s2155_s25, %s2752_s1 }
  0x10   : > { %p2157_p9 = pneg %p2316_p7 }
  0x12   : > { %p2158_p10 = pnand %p2157_p9, %p2156_p8 }
  0x14   : > { %p2159_p11 = pneg %p2158_p10 }
  0x16   : > { %p2164_p13 = pnand %p2162_p12, %p2159_p11 }
  0x18   : > { %2167 = shalt.err (!%p2164_p13)
}
  0x19   : > { %s2168_s30 = scalar_lea.vmem %s107_s18, 512  ;;  %p2176_p6 = scmp.lt.s32.totalorder %s107_s18, %s107_s18 }
  0x1a   : > { %p2169_p0 = scmp.ne.s32.totalorder %s107_s18, %s2168_s30  ;;  %p2177_p1 = scmp.lt.s32.totalorder %s2168_s30, %s2168_s30 }
  0x1c   : > { %p2171_p2 = pnand %p2169_p0, %p2157_p9  ;;  %p2178_p4 = por %p2177_p1, %p2176_p6 }
  0x1e   : > { %p2172_p3 = pneg %p2171_p2 }
  0x20   : > { %p2179_p5 = pnand %p2178_p4, %p2172_p3 }
  0x22   : > { %2182 = shalt.err (!%p2179_p5)
}
  0x23   : > { %s2254_s3 = smov 128   ;;  %s2255_s4 = smov 8  }
  0x24   : > { %2006 = dma.hbm_to_vmem [thread:$0]  (!%p2316_p7), %s2752_s1, 512, %s107_s18, [#allocation5], %s2254_s3, %s2254_s3, %s2255_s4  }
  0x25   : > { %p21_p1 = scmp.eq.s32.totalorder %s20_s22, 0  ;;  %p30_p4 = scmp.ne.s32.totalorder %s2247_s11, %s2243_s10 }
  0x26   : > { %p31_p5 = scmp.eq.s32.totalorder %s2251_s12, 0  ;;  %p2012_p8 = scmp.lt.s32.totalorder %s2251_s12, 4 }
  0x27   : > { %s2350_s7 = scalar_select %p21_p1, %s2247_s11, %s23_s21  }
  0x28   : > { %p32_p9 = por %p31_p5, %p30_p4  ;;  %s120_s8 = sand.u32 1, %s2247_s11  }
  0x29   : > { %s1598_s9 = sshll.u32 %s120_s8, 7  ;;  %s1675_s17 = sshll.u32 %s2251_s12, 11 }
  0x2a   : > { %s2357_s19 = scalar_lea.hbm %s2751_s0, %s1675_s17  ;;  %s124_s18 = scalar_lea.vmem [#allocation2], %s1598_s9 }
  0x2b   : > { %s132_s22 = sshll.u32 %s124_s18, 4  ;;  %p2361_p7 = pnand %p2012_p8, %p32_p9  ;;  %s2359_s22 = int_to_ptr.vmem [resolvable:$true] %s132_s22 }
  0x2c   : > { %s2365_s25 = scalar_lea.sflag [#allocation3], %s120_s8  ;;  %s2183_s26 = scalar_lea.hbm %s2357_s19, 2048 }
  0x2d   : > { %p2184_p10 = scmp.ne.s32.totalorder %s2357_s19, %s2183_s26  ;;  %p2185_p11 = pneg %p2361_p7 }
  0x2e   : > { %s2188_s29 = scalar_lea.hbm %s2751_s0, 8192  ;;  %p2189_p0 = scmp.lt.u32.totalorder %s2357_s19, %s2751_s0 }
  0x2f   : > { %p2186_p12 = pnand %p2185_p11, %p2184_p10  ;;  %p2190_p2 = scmp.lt.u32.totalorder %s2188_s29, %s2183_s26 }
  0x30   : > { %p2192_p6 = scmp.lt.u32.totalorder %s2183_s26, %s2357_s19 }
  0x31   : > { %p2187_p13 = pneg %p2186_p12  ;;  %p2191_p3 = por %p2190_p2, %p2189_p0 }
  0x33   : > { %p2193_p1 = por %p2192_p6, %p2191_p3 }
  0x35   : > { %p2194_p4 = pnand %p2193_p1, %p2187_p13 }
  0x37   : > { %2197 = shalt.err (!%p2194_p4)
}
  0x38   : > { %s2198_s6 = scalar_lea.vmem %s2359_s22, 2048  ;;  %s2256_s8 = smov [#allocation2]  }
  0x39   : > { %p2199_p5 = scmp.ne.s32.totalorder %s2359_s22, %s2198_s6  ;;  %s2203_s9 = sshll.u32 %s2256_s8, 4  ;;  %s2204_s9 = int_to_ptr.vmem [resolvable:$false] %s2203_s9 }
  0x3a   : > { %s2205_s17 = scalar_lea.vmem %s2204_s9, 4096  ;;  %p2206_p10 = scmp.lt.s32.totalorder %s2359_s22, %s2204_s9 }
  0x3b   : > { %p2201_p8 = pnand %p2199_p5, %p2185_p11  ;;  %p2207_p12 = scmp.lt.s32.totalorder %s2205_s17, %s2198_s6 }
  0x3d   : > { %p2202_p9 = pneg %p2201_p8  ;;  %p2208_p0 = por %p2207_p12, %p2206_p10 }
  0x3f   : > { %p2209_p2 = pnand %p2208_p0, %p2202_p9 }
  0x41   : > { %2212 = shalt.err (!%p2209_p2)
}
  0x42   : > { %2010 = dma.hbm_to_vmem [thread:$0]  (!%p2361_p7), %s2357_s19, 2048, %s2359_s22, %s2365_s25, %s2254_s3, %s2254_s3, %s2255_s4  }
  0x43   : > { %p2763_p11 = scmp.ne.s32.totalorder %s2760_s16, 0 }
  0x44   : > { %s146_s23 = sand.u32 (!%p2763_p11), 1, %s2243_s10   ;;  %p2764_p13 = scmp.ne.s32.totalorder (!%p2763_p11), %s2759_s15, 0 }
  0x45   : > { %144 = sbr.rel (%p2763_p11) target bundleno = 1053 (0x41d), region = 28  ;;  %s1603_s24 = sshll.u32 (!%p2763_p11), %s146_s23, 7 }
  0x46   : > { %s147_s18 = scalar_lea.sflag (!%p2763_p11), [#allocation3], %s146_s23  ;;  %s2399_s26 = scalar_lea.vmem (!%p2763_p11), [#allocation2], %s1603_s24 }
  0x4c   : > { %2230 = dma.done.wait (%p2764_p13), %s147_s18, 2048  }
  0x4d   : > { %2232 = vsyncadd (%p2764_p13), %s147_s18, 4294965248  ;;  %p2765_p3 = scmp.ne.s32.totalorder %s2758_s14, 0 }
  0x4f   : > { %2234 = dma.done.wait (%p2765_p3), [#allocation5], 512  }
  0x50   : > { %2236 = vsyncadd (%p2765_p3), [#allocation5], 4294966784  ;;  %vm204_vm0 = vcmask 261120   ;;  %v200_v0 = vld [vmem:[#allocation4] sm:$0xff]  ;;  %v201_v1 = vld [vmem:[#allocation4 + $0x8] sm:$0xff]  ;;  %vm410_vm1 = vcmask 130048  }
  0x51   : > { %v202_v2 = vld [vmem:[#allocation4 + $0x10] sm:$0xff]  ;;  %v1905_v3 = vpack.c.bf16 %v201_v1, %v200_v0  ;;  %v203_v4 = vld [vmem:[#allocation4 + $0x18] sm:$0xff]  ;;  %v184_v5 = vld [vmem:[%s2399_s26] sm:$0xff]  ;;  %s2257_s14 = smov 112   ;;  %s2258_s15 = smov 96  }
  0x52   : > { %v1909_v6 = vpack.c.bf16 %v203_v4, %v202_v2  ;;  %1769 = vmatprep.mubr.msk.f32.mxu0 %vm204_vm0, %v184_v5  ;;  %v185_v7 = vld [vmem:[%s2399_s26 + $0x8] sm:$0xff]  ;;  %v186_v8 = vld [vmem:[%s2399_s26 + $0x10] sm:$0xff]  ;;  %v187_v9 = vld [vmem:[%s2399_s26 + $0x18] sm:$0xff]  ;;  %s1605_s16 = sshll.u32 %s1593_s13, 2 }
  0x53   : > { %1906 = vmatprep.subr.bf16.mxu0 %v1905_v3  ;;  %v188_v10 = vld [vmem:[%s2399_s26 + $0x20] sm:$0xff]  ;;  %v189_v11 = vld [vmem:[%s2399_s26 + $0x28] sm:$0xff]  ;;  %v190_v12 = vld [vmem:[%s2399_s26 + $0x30] sm:$0xff]  ;;  %p178_p7 = scmp.lt.s32.totalorder %s1605_s16, 15 }
  0x54   : > { %1908 = vmatpush3.bf16.msra.mxu0 %v1905_v3  ;;  %v191_v13 = vld [vmem:[%s2399_s26 + $0x38] sm:$0xff]  ;;  %v192_v14 = vld [vmem:[%s2399_s26 + $0x40] sm:$0xff]  ;;  %v193_v15 = vld [vmem:[%s2399_s26 + $0x48] sm:$0xff] }
  0x55   : > { %1910 = vmatprep.subr.bf16.mxu0 %v1909_v6  ;;  %v194_v16 = vld [vmem:[%s2399_s26 + $0x50] sm:$0xff]  ;;  %v195_v17 = vld [vmem:[%s2399_s26 + $0x58] sm:$0xff]  ;;  %v196_v18 = vld [vmem:[%s2399_s26 + $0x60] sm:$0xff]  ;;  %s2773_s16 = smov (!%p178_p7, %s1605_s16), 15 }
  0x56   : > { %v197_v19 = vld [vmem:[%s2399_s26 + $0x68] sm:$0xff]  ;;  %v198_v20 = vld [vmem:[%s2399_s26 + $0x70] sm:$0xff]  ;;  %v199_v21 = vld [vmem:[%s2399_s26 + $0x78] sm:$0xff]  ;;  %s1676_s3 = sshll.u32 %s2773_s16, 5 }
  0x57   : > { %vm2443_vm2 = vmpackc.low %vm410_vm1, %vm410_vm1  ;;  %s2704_s22 = scalar_lea.vmem %s2753_s2, %s1676_s3 }
  0x58   : > { %1912 = vmatpush3.bf16.msra.mxu0 %v1909_v6 }
  0x5b   : > { %1770 = vmatmul.mubr.msk.f32.vlgmr.msra.gmra.mrb[0].mxu0 %vm204_vm0, %v185_v7 }
  0x5c   : > { %1772 = vmatprep.mubr.msk.f32.mxu0 %vm204_vm0, %v186_v8 }
  0x5f   : > { %1773 = vmatmul.mubr.msk.f32.gmra.mrb[2].mxu0 %vm204_vm0, %v187_v9 }
  0x60   : > { %1775 = vmatprep.mubr.msk.f32.mxu0 %vm204_vm0, %v188_v10 }
  0x63   : > { %1776 = vmatmul.mubr.msk.f32.gmra.mrb[4].mxu0 %vm204_vm0, %v189_v11 }
  0x64   : > { %1778 = vmatprep.mubr.msk.f32.mxu0 %vm204_vm0, %v190_v12 }
  0x67   : > { %1779 = vmatmul.mubr.msk.f32.gmra.mrb[6].mxu0 %vm204_vm0, %v191_v13 }
  0x68   : > { %1781 = vmatprep.mubr.msk.f32.mxu0 %vm204_vm0, %v192_v14 }
  0x6b   : > { %1782 = vmatmul.mubr.msk.f32.gmra.mrb[8].mxu0 %vm204_vm0, %v193_v15 }
  0x6c   : > { %1784 = vmatprep.mubr.msk.f32.mxu0 %vm204_vm0, %v194_v16 }
  0x6f   : > { %1785 = vmatmul.mubr.msk.f32.gmra.mrb[10].mxu0 %vm204_vm0, %v195_v17 }
  0x70   : > { %1787 = vmatprep.mubr.msk.f32.mxu0 %vm204_vm0, %v196_v18 }
  0x73   : > { %1788 = vmatmul.mubr.msk.f32.gmra.mrb[12].mxu0 %vm204_vm0, %v197_v19 }
  0x74   : > { %1790 = vmatprep.mubr.msk.f32.mxu0 %vm204_vm0, %v198_v20 }
  0x77   : > { %1791 = vmatmul.mubr.msk.f32.gmra.mrb[14].mxu0 %vm204_vm0, %v199_v21 }
 0x12e   : > { %v1771_v22 = vpop.f32.mrb[0].mxu0 }
 0x12f   : > { %v319_v23 = vpop.f32.mrb[1].mxu0 }
 0x130   : > { %v2051_v25 = vpack.i.bf16 %v1771_v22, %v319_v23  ;;  %402 = vrot.lane.b32.xlu0 %v319_v23, %s2257_s14  ;;  %v1913_v26 = vpack.c.bf16 %v1771_v22, %v319_v23 }
 0x132   : > { %v1774_v27 = vpop.f32.mrb[2].mxu0  ;;  %1915 = vmatprep.subr.msk.bf16.mxu1 %vm2443_vm2, %v1913_v26 }
 0x133   : > { %1918 = vmatpush3.bf16.xpose.msk.msra.mxu1 %vm2443_vm2, %v1913_v26  ;;  %408 = vrot.lane.b32.xlu1 %v1774_v27, %s2257_s14  ;;  %v329_v28 = vpop.f32.mrb[3].mxu0 }
 0x134   : > { %404 = vrot.lane.b32.xlu0 %v1771_v22, %s2257_s14  ;;  %v2056_v29 = vpack.i.bf16 %v1774_v27, %v329_v28  ;;  %v1919_v30 = vpack.c.bf16 %v1774_v27, %v329_v28  ;;  %v851_v27 = vlaneseq }
 0x136   : > { %v1777_v31 = vpop.f32.mrb[4].mxu0  ;;  %1921 = vmatprep.subr.msk.bf16.mxu1 %vm2443_vm2, %v1919_v30 }
 0x137   : > { %406 = vrot.lane.b32.xlu1 %v329_v28, %s2257_s14  ;;  %v339_v32 = vpop.f32.mrb[5].mxu0  ;;  %v852_v28 = vshrl.u32 %v851_v27, 7 }
 0x138   : > { %v2061_v33 = vpack.i.bf16 %v1777_v31, %v339_v32  ;;  %v1925_v34 = vpack.c.bf16 %v1777_v31, %v339_v32  ;;  %516 = vrot.lane.b32.xlu0 %v339_v32, %s2257_s14 }
 0x13a   : > { %v1780_v35 = vpop.f32.mrb[6].mxu0 }
 0x13b   : > { %1924 = vmatpush3.bf16.xpose.msk.msra.mxu1 %vm2443_vm2, %v1919_v30  ;;  %518 = vrot.lane.b32.xlu1 %v1777_v31, %s2257_s14  ;;  %v349_v36 = vpop.f32.mrb[7].mxu0  ;;  %v2540_v30 = vand.u32 127, %v851_v27  ;;  %v855_v31 = vadd.s32 24, %v852_v28 }
 0x13c   : > { %1927 = vmatprep.subr.msk.bf16.mxu1 %vm2443_vm2, %v1925_v34  ;;  %522 = vrot.lane.b32.xlu0 %v1780_v35, %s2257_s14  ;;  %v2071_v37 = vpack.i.bf16 %v1780_v35, %v349_v36  ;;  %v1931_v38 = vpack.c.bf16 %v1780_v35, %v349_v36  ;;  %v854_v35 = vadd.s32 16, %v852_v28 }
 0x13d   : > { %vm858_vm4 = vcmp.le.s32.totalorder %v2540_v30, %v852_v28  ;;  %vm861_vm5 = vcmp.le.s32.totalorder %v2540_v30, %v855_v31 }
 0x13e   : > { %v1783_v39 = vpop.f32.mrb[8].mxu0  ;;  %vm860_vm6 = vcmp.le.s32.totalorder %v2540_v30, %v854_v35 }
 0x13f   : > { %631 = vrot.lane.b32.xlu1 %v1783_v39, %s2257_s14  ;;  %v359_v40 = vpop.f32.mrb[9].mxu0 }
 0x140   : > { %520 = vrot.lane.b32.xlu0 %v349_v36, %s2257_s14  ;;  %v2066_v41 = vpack.i.bf16 %v1783_v39, %v359_v40  ;;  %v1937_v42 = vpack.c.bf16 %v1783_v39, %v359_v40 }
 0x142   : > { %v1786_v43 = vpop.f32.mrb[10].mxu0  ;;  %1939 = vmatprep.subr.msk.bf16.mxu0 %vm2443_vm2, %v1937_v42 }
 0x143   : > { %629 = vrot.lane.b32.xlu1 %v359_v40, %s2257_s14  ;;  %1942 = vmatpush3.bf16.xpose.msk.msra.mxu0 %vm2443_vm2, %v1937_v42  ;;  %v369_v44 = vpop.f32.mrb[11].mxu0 }
 0x144   : > { %635 = vrot.lane.b32.xlu0 %v1786_v43, %s2257_s14  ;;  %v2076_v45 = vpack.i.bf16 %v1786_v43, %v369_v44  ;;  %v1943_v46 = vpack.c.bf16 %v1786_v43, %v369_v44 }
 0x146   : > { %v2472_v47 = vpop.f32.mrb[12].mxu0  ;;  %1945 = vmatprep.subr.msk.bf16.mxu0 %vm2443_vm2, %v1943_v46 }
 0x147   : > { %v2476_v48 = vpop.f32.mrb[13].mxu0 }
 0x148   : > { %v2081_v49 = vpack.i.bf16 %v2472_v47, %v2476_v48  ;;  %v1949_v50 = vpack.c.bf16 %v2472_v47, %v2476_v48  ;;  %633 = vrot.lane.b32.xlu0 %v369_v44, %s2257_s14  ;;  %742 = vrot.lane.b32.xlu1 %v2476_v48, %s2257_s14 }
 0x14a   : > { %v2485_v51 = vpop.f32.mrb[14].mxu0 }
 0x14b   : > { %v2487_v52 = vpop.f32.mrb[15].mxu0  ;;  %1948 = vmatpush3.bf16.xpose.msk.msra.mxu0 %vm2443_vm2, %v1943_v46 }
 0x14c   : > { %v2086_v53 = vpack.i.bf16 %v2485_v51, %v2487_v52  ;;  %v1955_v54 = vpack.c.bf16 %v2485_v51, %v2487_v52  ;;  %744 = vrot.lane.b32.xlu1 %v2472_v47, %s2257_s14  ;;  %746 = vrot.lane.b32.xlu0 %v2487_v52, %s2257_s14 }
 0x150   : > { %748 = vrot.lane.b32.xlu1 %v2485_v51, %s2257_s14  ;;  %2057 = vrot.lane.b32.xlu0 %v2056_v29, %s2258_s15  ;;  %v853_v29 = vadd.s32 8, %v852_v28 }
 0x152   : > { %vm859_vm3 = vcmp.le.s32.totalorder %v2540_v30, %v853_v29 }
 0x154   : > { %2052 = vrot.lane.b32.xlu1 %v2051_v25, %s2258_s15  ;;  %2072 = vrot.lane.b32.xlu0 %v2071_v37, %s2258_s15 }
 0x158   : > { %2062 = vrot.lane.b32.xlu1 %v2061_v33, %s2258_s15 }
 0x15c   : > { %2067 = vrot.lane.b32.xlu1 %v2066_v41, %s2258_s15 }
 0x160   : > { %2077 = vrot.lane.b32.xlu1 %v2076_v45, %s2258_s15 }
 0x1a2   : > { %v403_v55 = vpop.permute.xlu0 %402 }
 0x1a3   : > { %1801 = vmatprep.mubr.msk.f32.mxu1 %vm410_vm1, %v403_v55 }
 0x1a5   : > { %v409_v56 = vpop.permute.xlu1 %408 }
 0x1a6   : > { %v405_v57 = vpop.permute.xlu0 %404 }
 0x1a7   : > { %1802 = vmatmul.mubr.msk.f32.vlgmr.msra.gmra.mrb[0].mxu1 %vm410_vm1, %v405_v57 }
 0x1a8   : > { %1930 = vmatpush3.bf16.xpose.msk.msra.mxu1 %vm2443_vm2, %v1925_v34 }
 0x1a9   : > { %1933 = vmatprep.subr.msk.bf16.mxu1 %vm2443_vm2, %v1931_v38  ;;  %v407_v58 = vpop.permute.xlu1 %406 }
 0x1aa   : > { %1804 = vmatprep.mubr.msk.f32.mxu1 %vm410_vm1, %v407_v58  ;;  %v517_v59 = vpop.permute.xlu0 %516 }
 0x1ab   : > { %1805 = vmatmul.mubr.msk.f32.gmra.mrb[2].mxu1 %vm410_vm1, %v409_v56 }
 0x1ac   : > { %1815 = vmatprep.mubr.msk.f32.mxu1 %vm410_vm1, %v517_v59 }
 0x1ad   : > { %v519_v60 = vpop.permute.xlu1 %518 }
 0x1ae   : > { %v523_v61 = vpop.permute.xlu0 %522 }
 0x1b0   : > { %1936 = vmatpush3.bf16.xpose.msk.msra.mxu1 %vm2443_vm2, %v1931_v38 }
 0x1b1   : > { %1951 = vmatprep.subr.msk.bf16.mxu1 %vm2443_vm2, %v1949_v50  ;;  %v632_v62 = vpop.permute.xlu1 %631 }
 0x1b2   : > { %v521_v63 = vpop.permute.xlu0 %520 }
 0x1b5   : > { %v630_v0 = vpop.permute.xlu1 %629 }
 0x1b6   : > { %1829 = vmatprep.mubr.msk.f32.mxu0 %vm410_vm1, %v630_v0  ;;  %v636_v1 = vpop.permute.xlu0 %635 }
 0x1b7   : > { %1816 = vmatmul.mubr.msk.f32.vlgmr.msra.gmra.mrb[4].mxu1 %vm410_vm1, %v519_v60  ;;  %1830 = vmatmul.mubr.msk.f32.vlgmr.msra.gmra.mrb[16].mxu0 %vm410_vm1, %v632_v62 }
 0x1b8   : > { %1818 = vmatprep.mubr.msk.f32.mxu1 %vm410_vm1, %v521_v63  ;;  %1954 = vmatpush3.bf16.xpose.msk.msra.mxu1 %vm2443_vm2, %v1949_v50 }
 0x1b9   : > { %1957 = vmatprep.subr.msk.bf16.mxu1 %vm2443_vm2, %v1955_v54 }
 0x1ba   : > { %v634_v2 = vpop.permute.xlu0 %633  ;;  %v743_v3 = vpop.permute.xlu1 %742 }
 0x1bb   : > { %1819 = vmatmul.mubr.msk.f32.gmra.mrb[6].mxu1 %vm410_vm1, %v523_v61  ;;  %1832 = vmatprep.mubr.msk.f32.mxu0 %vm410_vm1, %v634_v2 }
 0x1bc   : > { %1833 = vmatmul.mubr.msk.f32.gmra.mrb[18].mxu0 %vm410_vm1, %v636_v1  ;;  %1843 = vmatprep.mubr.msk.f32.mxu1 %vm410_vm1, %v743_v3 }
 0x1be   : > { %v745_v4 = vpop.permute.xlu1 %744  ;;  %v747_v5 = vpop.permute.xlu0 %746 }
 0x1c0   : > { %1960 = vmatpush3.bf16.xpose.msk.msra.mxu1 %vm2443_vm2, %v1955_v54 }
 0x1c2   : > { %v749_v6 = vpop.permute.xlu1 %748  ;;  %v2058_v7 = vpop.permute.xlu0 %2057 }
 0x1c3   : > { %v2060_v9 = vunpack.i.h.bf16 %v2058_v7  ;;  %v2059_v10 = vunpack.i.l.bf16 %v2058_v7 }
 0x1c5   : > { %v1965_v15 = vpack.c.bf16 %v2060_v9, %v2059_v10 }
 0x1c6   : > { %v2053_v8 = vpop.permute.xlu1 %2052 }
 0x1c7   : > { %v2055_v11 = vunpack.i.h.bf16 %v2053_v8  ;;  %v2054_v12 = vunpack.i.l.bf16 %v2053_v8  ;;  %1844 = vmatmul.mubr.msk.f32.vlgmr.msra.gmra.mrb[8].mxu1 %vm410_vm1, %v745_v4 }
 0x1c8   : > { %1846 = vmatprep.mubr.msk.f32.mxu1 %vm410_vm1, %v747_v5 }
 0x1c9   : > { %v1961_v13 = vpack.c.bf16 %v2055_v11, %v2054_v12 }
 0x1ca   : > { %v2063_v14 = vpop.permute.xlu1 %2062 }
 0x1cb   : > { %v2065_v16 = vunpack.i.h.bf16 %v2063_v14  ;;  %v2064_v17 = vunpack.i.l.bf16 %v2063_v14  ;;  %1847 = vmatmul.mubr.msk.f32.gmra.mrb[10].mxu1 %vm410_vm1, %v749_v6  ;;  %1962 = vmatprep.subr.bf16.mxu0 %v1961_v13 }
 0x1cc   : > { %1964 = vmatpush3.bf16.msra.mxu0 %v1961_v13 }
 0x1cd   : > { %1966 = vmatprep.subr.bf16.mxu0 %v1965_v15  ;;  %v2537_v19 = vpack.c.bf16 %v2065_v16, %v2064_v17 }
 0x1ce   : > { %v2068_v18 = vpop.permute.xlu1 %2067 }
 0x1cf   : > { %v2070_v20 = vunpack.i.h.bf16 %v2068_v18  ;;  %v2069_v21 = vunpack.i.l.bf16 %v2068_v18 }
 0x1d0   : > { %1968 = vmatpush3.bf16.msra.mxu0 %v1965_v15 }
 0x1d1   : > { %v1977_v22 = vpack.c.bf16 %v2070_v20, %v2069_v21  ;;  %1970 = vmatprep.subr.bf16.mxu0 %v2537_v19 }
 0x1d2   : > { %v2078_v23 = vpop.permute.xlu1 %2077 }
 0x1d3   : > { %v2080_v24 = vunpack.i.h.bf16 %v2078_v23  ;;  %v2079_v25 = vunpack.i.l.bf16 %v2078_v23  ;;  %1978 = vmatprep.subr.bf16.mxu1 %v1977_v22 }
 0x1d4   : > { %1980 = vmatpush3.bf16.msra.mxu1 %v1977_v22 }
 0x1d5   : > { %v1981_v26 = vpack.c.bf16 %v2080_v24, %v2079_v25  ;;  %v2073_v24 = vpop.permute.xlu0 %2072 }
 0x1d7   : > { %1982 = vmatprep.subr.bf16.mxu1 %v1981_v26 }
 0x1d8   : > { %1984 = vmatpush3.bf16.msra.mxu1 %v1981_v26 }
 0x27a   : > { %v1803_v32 = vpop.f32.mrb[0].mxu1 }
 0x27b   : > { %v2546_v33 = vsel %vm859_vm3, %v1803_v32, -inf  ;;  %v493_v34 = vpop.f32.mrb[1].mxu1  ;;  %v2074_v32 = vunpack.i.l.bf16 %v2073_v24 }
 0x27c   : > { %v2550_v36 = vsel %vm858_vm4, %v493_v34, -inf  ;;  %v889_v37 = vsel %vm204_vm0, %v2546_v33, -inf }
 0x27d   : > { %890 = vmax.xlane.f32.xlu1 %v889_v37  ;;  %v886_v38 = vsel %vm204_vm0, %v2550_v36, -inf }
 0x27e   : > { %v1806_v39 = vpop.f32.mrb[2].mxu1  ;;  %887 = vmax.xlane.f32.xlu0 %v886_v38 }
 0x27f   : > { %v2559_v40 = vsel %vm861_vm5, %v1806_v39, -inf  ;;  %v503_v41 = vpop.f32.mrb[3].mxu1 }
 0x280   : > { %v895_v42 = vsel %vm204_vm0, %v2559_v40, -inf  ;;  %v2566_v43 = vsel %vm860_vm6, %v503_v41, -inf }
 0x281   : > { %v892_v44 = vsel %vm204_vm0, %v2566_v43, -inf }
 0x282   : > { %896 = vmax.xlane.f32.xlu0 %v895_v42 }
 0x286   : > { %893 = vmax.xlane.f32.xlu0 %v892_v44 }
 0x28a   : > { %v1817_v45 = vpop.f32.mrb[4].mxu1  ;;  %v1831_v46 = vpop.f32.mrb[16].mxu0 }
 0x28b   : > { %v2572_v50 = vsel %vm859_vm3, %v1817_v45, -inf  ;;  %v606_v54 = vpop.f32.mrb[5].mxu1  ;;  %v2576_v55 = vsel %vm859_vm3, %v1831_v46, -inf  ;;  %v719_v56 = vpop.f32.mrb[17].mxu0 }
 0x28c   : > { %v901_v57 = vsel %vm204_vm0, %v2572_v50, -inf  ;;  %v913_v58 = vsel %vm204_vm0, %v2576_v55, -inf  ;;  %v2584_v59 = vsel %vm858_vm4, %v606_v54, -inf  ;;  %v2588_v60 = vsel %vm858_vm4, %v719_v56, -inf }
 0x28d   : > { %902 = vmax.xlane.f32.xlu1 %v901_v57  ;;  %914 = vmax.xlane.f32.xlu0 %v913_v58  ;;  %v898_v0 = vsel %vm204_vm0, %v2584_v59, -inf  ;;  %v910_v2 = vsel %vm204_vm0, %v2588_v60, -inf }
 0x28e   : > { %v1820_v61 = vpop.f32.mrb[6].mxu1 }
 0x28f   : > { %v616_v62 = vpop.f32.mrb[7].mxu1  ;;  %v1834_v63 = vpop.f32.mrb[18].mxu0  ;;  %v2596_v3 = vsel %vm861_vm5, %v1820_v61, -inf }
 0x290   : > { %v729_v1 = vpop.f32.mrb[19].mxu0  ;;  %v2600_v4 = vsel %vm861_vm5, %v1834_v63, -inf  ;;  %v907_v5 = vsel %vm204_vm0, %v2596_v3, -inf  ;;  %v2608_v7 = vsel %vm860_vm6, %v616_v62, -inf }
 0x291   : > { %899 = vmax.xlane.f32.xlu1 %v898_v0  ;;  %911 = vmax.xlane.f32.xlu0 %v910_v2  ;;  %v919_v6 = vsel %vm204_vm0, %v2600_v4, -inf  ;;  %v2612_v8 = vsel %vm860_vm6, %v729_v1, -inf  ;;  %v904_v9 = vsel %vm204_vm0, %v2608_v7, -inf }
 0x292   : > { %v916_v10 = vsel %vm204_vm0, %v2612_v8, -inf }
 0x295   : > { %908 = vmax.xlane.f32.xlu1 %v907_v5  ;;  %920 = vmax.xlane.f32.xlu0 %v919_v6 }
 0x299   : > { %905 = vmax.xlane.f32.xlu1 %v904_v9  ;;  %917 = vmax.xlane.f32.xlu0 %v916_v10 }
 0x29a   : > { %v1845_v11 = vpop.f32.mrb[8].mxu1 }
 0x29b   : > { %v2620_v12 = vsel %vm859_vm3, %v1845_v11, -inf  ;;  %v832_v13 = vpop.f32.mrb[9].mxu1 }
 0x29c   : > { %v925_v14 = vsel %vm204_vm0, %v2620_v12, -inf  ;;  %v2626_v15 = vsel %vm858_vm4, %v832_v13, -inf }
 0x29d   : > { %926 = vmax.xlane.f32.xlu1 %v925_v14  ;;  %v922_v20 = vsel %vm204_vm0, %v2626_v15, -inf }
 0x29e   : > { %v1848_v16 = vpop.f32.mrb[10].mxu1 }
 0x29f   : > { %v2630_v17 = vsel %vm861_vm5, %v1848_v16, -inf  ;;  %v842_v18 = vpop.f32.mrb[11].mxu1 }
 0x2a0   : > { %v931_v21 = vsel %vm204_vm0, %v2630_v17, -inf  ;;  %v2638_v22 = vsel %vm860_vm6, %v842_v18, -inf }
 0x2a1   : > { %923 = vmax.xlane.f32.xlu1 %v922_v20  ;;  %932 = vmax.xlane.f32.xlu0 %v931_v21  ;;  %v928_v23 = vsel %vm204_vm0, %v2638_v22, -inf }
 0x2a5   : > { %929 = vmax.xlane.f32.xlu0 %v928_v23 }
 0x2b2   : > { %2087 = vrot.lane.b32.xlu1 %v2086_v53, %s2258_s15 }
 0x2bb   : > { %2082 = vrot.lane.b32.xlu0 %v2081_v49, %s2258_s15  ;;  %v2075_v49 = vunpack.i.h.bf16 %v2073_v24 }
 0x2bd   : > { %v1973_v41 = vpack.c.bf16 %v2075_v49, %v2074_v32 }
 0x30a   : > { %v891_v25 = vpop.xlane.xlu1 %890 }
 0x30b   : > { %v935_v26 = vsub.f32 %v2546_v33, %v891_v25  ;;  %v888_v27 = vpop.xlane.xlu0 %887 }
 0x30c   : > { %v934_v28 = vsub.f32 %v2550_v36, %v888_v27 }
 0x30d   : > { %v952_v29 = vmul.f32 1.442695, %v935_v26 }
 0x30e   : > { %v950_v30 = vmul.f32 1.442695, %v934_v28 }
 0x30f   : > { %2091 = vpow2.f32 %v952_v29  ;;  %v897_v31 = vpop.xlane.xlu0 %896 }
 0x310   : > { %2093 = vpow2.f32 %v950_v30  ;;  %v937_v51 = vsub.f32 %v2559_v40, %v897_v31 }
 0x312   : > { %v956_v52 = vmul.f32 1.442695, %v937_v51 }
 0x313   : > { %v894_v53 = vpop.xlane.xlu0 %893 }
 0x314   : > { %2095 = vpow2.f32 %v956_v52  ;;  %v936_v47 = vsub.f32 %v2566_v43, %v894_v53 }
 0x316   : > { %v954_v48 = vmul.f32 1.442695, %v936_v47 }
 0x318   : > { %2097 = vpow2.f32 %v954_v48 }
 0x319   : > { %v2092_v33 = vpop.eup %2091 }
 0x31a   : > { %v2094_v34 = vpop.eup %2093  ;;  %v903_v35 = vpop.xlane.xlu1 %902  ;;  %v985_v37 = vsel %vm204_vm0, %v2092_v33, 0.0 }
 0x31b   : > { %v915_v36 = vpop.xlane.xlu0 %914  ;;  %v939_v38 = vsub.f32 %v2572_v50, %v903_v35  ;;  %1857 = vmatprep.mubr.msk.f32.mxu0 %vm204_vm0, %v2094_v34  ;;  %986 = vadd.xlane.f32.xlu1 %v985_v37  ;;  %v982_v40 = vsel %vm204_vm0, %v2094_v34, 0.0 }
 0x31c   : > { %v943_v39 = vsub.f32 %v2576_v55, %v915_v36  ;;  %1858 = vmatmul.mubr.msk.f32.vlgmr.msra.gmra.mrb[20].mxu0 %vm204_vm0, %v2092_v33  ;;  %983 = vadd.xlane.f32.xlu0 %v982_v40 }
 0x31d   : > { %v960_v42 = vmul.f32 1.442695, %v939_v38  ;;  %1972 = vmatpush3.bf16.msra.mxu0 %v2537_v19 }
 0x31e   : > { %v2096_v43 = vpop.eup %2095  ;;  %v968_v44 = vmul.f32 1.442695, %v943_v39  ;;  %v900_v45 = vpop.xlane.xlu1 %899  ;;  %1974 = vmatprep.subr.bf16.mxu0 %v1973_v41 }
 0x31f   : > { %v912_v46 = vpop.xlane.xlu0 %911  ;;  %2099 = vpow2.f32 %v960_v42  ;;  %v938_v50 = vsub.f32 %v2584_v59, %v900_v45  ;;  %v991_v55 = vsel %vm204_vm0, %v2096_v43, 0.0 }
 0x320   : > { %v942_v54 = vsub.f32 %v2588_v60, %v912_v46  ;;  %992 = vadd.xlane.f32.xlu0 %v991_v55  ;;  %2101 = vpow2.f32 %v968_v44 }
 0x321   : > { %v958_v56 = vmul.f32 1.442695, %v938_v50  ;;  %1976 = vmatpush3.bf16.msra.mxu0 %v1973_v41 }
 0x322   : > { %v966_v57 = vmul.f32 1.442695, %v942_v54  ;;  %v2098_v58 = vpop.eup %2097  ;;  %v909_v61 = vpop.xlane.xlu1 %908 }
 0x323   : > { %v921_v19 = vpop.xlane.xlu0 %920  ;;  %2103 = vpow2.f32 %v958_v56  ;;  %v941_v62 = vsub.f32 %v2596_v3, %v909_v61  ;;  %1860 = vmatprep.mubr.msk.f32.mxu0 %vm204_vm0, %v2098_v58  ;;  %v988_v59 = vsel %vm204_vm0, %v2098_v58, 0.0 }
 0x324   : > { %v945_v63 = vsub.f32 %v2600_v4, %v921_v19  ;;  %2105 = vpow2.f32 %v966_v57  ;;  %1861 = vmatmul.mubr.msk.f32.gmra.mrb[22].mxu0 %vm204_vm0, %v2096_v43  ;;  %989 = vadd.xlane.f32.xlu0 %v988_v59 }
 0x325   : > { %v964_v60 = vmul.f32 1.442695, %v941_v62 }
 0x326   : > { %v972_v0 = vmul.f32 1.442695, %v945_v63  ;;  %v906_v1 = vpop.xlane.xlu1 %905 }
 0x327   : > { %v918_v2 = vpop.xlane.xlu0 %917  ;;  %2107 = vpow2.f32 %v964_v60  ;;  %v940_v5 = vsub.f32 %v2608_v7, %v906_v1 }
 0x328   : > { %v944_v6 = vsub.f32 %v2612_v8, %v918_v2  ;;  %2109 = vpow2.f32 %v972_v0 }
 0x329   : > { %v2100_v3 = vpop.eup %2099  ;;  %v962_v9 = vmul.f32 1.442695, %v940_v5 }
 0x32a   : > { %v970_v4 = vmul.f32 1.442695, %v944_v6  ;;  %v927_v10 = vpop.xlane.xlu1 %926  ;;  %v997_v11 = vsel %vm204_vm0, %v2100_v3, 0.0  ;;  %v2102_v14 = vpop.eup %2101 }
 0x32b   : > { %2111 = vpow2.f32 %v962_v9  ;;  %v947_v13 = vsub.f32 %v2620_v12, %v927_v10  ;;  %998 = vadd.xlane.f32.xlu0 %v997_v11  ;;  %v1009_v12 = vsel %vm204_vm0, %v2102_v14, 0.0 }
 0x32c   : > { %2113 = vpow2.f32 %v970_v4 }
 0x32d   : > { %v2104_v16 = vpop.eup %2103  ;;  %v976_v18 = vmul.f32 1.442695, %v947_v13 }
 0x32e   : > { %v2106_v20 = vpop.eup %2105  ;;  %1871 = vmatprep.mubr.msk.f32.mxu0 %vm204_vm0, %v2104_v16  ;;  %v924_v7 = vpop.xlane.xlu1 %923  ;;  %v994_v21 = vsel %vm204_vm0, %v2104_v16, 0.0 }
 0x32f   : > { %v933_v8 = vpop.xlane.xlu0 %932  ;;  %2115 = vpow2.f32 %v976_v18  ;;  %v946_v23 = vsub.f32 %v2626_v15, %v924_v7  ;;  %1872 = vmatmul.mubr.msk.f32.vlgmr.msra.gmra.mrb[24].mxu0 %vm204_vm0, %v2100_v3  ;;  %995 = vadd.xlane.f32.xlu1 %v994_v21  ;;  %v1006_v29 = vsel %vm204_vm0, %v2106_v20, 0.0 }
 0x330   : > { %v949_v24 = vsub.f32 %v2630_v17, %v933_v8  ;;  %1885 = vmatprep.mubr.msk.f32.mxu1 %vm204_vm0, %v2106_v20  ;;  %1010 = vadd.xlane.f32.xlu0 %v1009_v12 }
 0x331   : > { %v2108_v25 = vpop.eup %2107  ;;  %v974_v26 = vmul.f32 1.442695, %v946_v23  ;;  %1886 = vmatmul.mubr.msk.f32.vlgmr.msra.gmra.mrb[12].mxu1 %vm204_vm0, %v2102_v14 }
 0x332   : > { %v980_v27 = vmul.f32 1.442695, %v949_v24  ;;  %v1003_v15 = vsel %vm204_vm0, %v2108_v25, 0.0  ;;  %v2110_v30 = vpop.eup %2109  ;;  %v2088_v51 = vpop.permute.xlu1 %2087 }
 0x333   : > { %v930_v28 = vpop.xlane.xlu0 %929  ;;  %2117 = vpow2.f32 %v974_v26  ;;  %1007 = vadd.xlane.f32.xlu1 %v1006_v29  ;;  %v2090_v33 = vunpack.i.h.bf16 %v2088_v51  ;;  %v2089_v34 = vunpack.i.l.bf16 %v2088_v51 }
 0x334   : > { %v948_v17 = vsub.f32 %v2638_v22, %v930_v28  ;;  %2119 = vpow2.f32 %v980_v27  ;;  %1004 = vadd.xlane.f32.xlu0 %v1003_v15  ;;  %v1015_v22 = vsel %vm204_vm0, %v2110_v30, 0.0 }
 0x335   : > { %v2112_v31 = vpop.eup %2111  ;;  %v1989_v39 = vpack.c.bf16 %v2090_v33, %v2089_v34 }
 0x336   : > { %v978_v52 = vmul.f32 1.442695, %v948_v17  ;;  %v2114_v53 = vpop.eup %2113  ;;  %1874 = vmatprep.mubr.msk.f32.mxu0 %vm204_vm0, %v2112_v31  ;;  %v1000_v48 = vsel %vm204_vm0, %v2112_v31, 0.0 }
 0x337   : > { %v2083_v47 = vpop.permute.xlu0 %2082  ;;  %1875 = vmatmul.mubr.msk.f32.gmra.mrb[26].mxu0 %vm204_vm0, %v2108_v25  ;;  %1001 = vadd.xlane.f32.xlu1 %v1000_v48  ;;  %v1012_v38 = vsel %vm204_vm0, %v2114_v53, 0.0 }
 0x338   : > { %2121 = vpow2.f32 %v978_v52  ;;  %v2085_v49 = vunpack.i.h.bf16 %v2083_v47  ;;  %v2084_v32 = vunpack.i.l.bf16 %v2083_v47  ;;  %1016 = vadd.xlane.f32.xlu0 %v1015_v22  ;;  %1888 = vmatprep.mubr.msk.f32.mxu1 %vm204_vm0, %v2114_v53 }
 0x339   : > { %v2116_v35 = vpop.eup %2115  ;;  %1889 = vmatmul.mubr.msk.f32.gmra.mrb[14].mxu1 %vm204_vm0, %v2110_v30 }
 0x33a   : > { %v1985_v36 = vpack.c.bf16 %v2085_v49, %v2084_v32  ;;  %v1021_v37 = vsel %vm204_vm0, %v2116_v35, 0.0 }
 0x33b   : > { %1013 = vadd.xlane.f32.xlu1 %v1012_v38 }
 0x33c   : > { %1986 = vmatprep.subr.bf16.mxu0 %v1985_v36  ;;  %1022 = vadd.xlane.f32.xlu0 %v1021_v37 }
 0x33d   : > { %1993 = vmatprep.subr.bf16.mxu1 %v1985_v36  ;;  %v2118_v40 = vpop.eup %2117  ;;  %1988 = vmatpush3.bf16.msra.mxu0 %v1985_v36 }
 0x33e   : > { %1995 = vmatpush3.bf16.msra.mxu1 %v1985_v36  ;;  %v2120_v41 = vpop.eup %2119  ;;  %1990 = vmatprep.subr.bf16.mxu0 %v1989_v39  ;;  %v1018_v42 = vsel %vm204_vm0, %v2118_v40, 0.0 }
 0x33f   : > { %1994 = vmatprep.subr.bf16.mxu1 %v1989_v39  ;;  %1899 = vmatprep.mubr.msk.f32.mxu0 %vm204_vm0, %v2118_v40  ;;  %v1027_v43 = vsel %vm204_vm0, %v2120_v41, 0.0 }
 0x340   : > { %1019 = vadd.xlane.f32.xlu1 %v1018_v42  ;;  %1028 = vadd.xlane.f32.xlu0 %v1027_v43 }
 0x341   : > { %1992 = vmatpush3.bf16.msra.mxu0 %v1989_v39 }
 0x342   : > { %v2122_v44 = vpop.eup %2121  ;;  %1996 = vmatpush3.bf16.msra.mxu1 %v1989_v39 }
 0x343   : > { %1902 = vmatprep.mubr.msk.f32.mxu1 %vm204_vm0, %v2122_v44  ;;  %v1024_v45 = vsel %vm204_vm0, %v2122_v44, 0.0 }
 0x344   : > { %1025 = vadd.xlane.f32.xlu1 %v1024_v45  ;;  %1900 = vmatmul.mubr.msk.f32.vlgmr.msra.gmra.mrb[28].mxu0 %vm204_vm0, %v2116_v35 }
 0x345   : > { %1903 = vmatmul.mubr.msk.f32.vlgmr.msra.gmra.mrb[16].mxu1 %vm204_vm0, %v2120_v41 }
 0x3a8   : > { %v987_v50 = vpop.xlane.xlu1 %986 }
 0x3a9   : > { %v984_v46 = vpop.xlane.xlu0 %983  ;;  %2123 = vrcp.f32 %v987_v50 }
 0x3aa   : > { %2125 = vrcp.f32 %v984_v46 }
 0x3ad   : > { %v993_v54 = vpop.xlane.xlu0 %992 }
 0x3ae   : > { %2127 = vrcp.f32 %v993_v54 }
 0x3b1   : > { %v990_v55 = vpop.xlane.xlu0 %989 }
 0x3b2   : > { %2129 = vrcp.f32 %v990_v55 }
 0x3b3   : > { %v2124_v58 = vpop.eup %2123 }
 0x3b4   : > { %v2126_v19 = vpop.eup %2125 }
 0x3b8   : > { %v999_v56 = vpop.xlane.xlu0 %998  ;;  %v2128_v1 = vpop.eup %2127 }
 0x3b9   : > { %2131 = vrcp.f32 %v999_v56 }
 0x3bc   : > { %v996_v57 = vpop.xlane.xlu1 %995  ;;  %v2130_v5 = vpop.eup %2129 }
 0x3bd   : > { %v1011_v60 = vpop.xlane.xlu0 %1010  ;;  %2133 = vrcp.f32 %v996_v57 }
 0x3be   : > { %2135 = vrcp.f32 %v1011_v60 }
 0x3c0   : > { %v1008_v0 = vpop.xlane.xlu1 %1007 }
 0x3c1   : > { %v1005_v6 = vpop.xlane.xlu0 %1004  ;;  %2137 = vrcp.f32 %v1008_v0 }
 0x3c2   : > { %2139 = vrcp.f32 %v1005_v6 }
 0x3c3   : > { %v2132_v14 = vpop.eup %2131 }
 0x3c4   : > { %v1002_v4 = vpop.xlane.xlu1 %1001 }
 0x3c5   : > { %v1017_v11 = vpop.xlane.xlu0 %1016  ;;  %2141 = vrcp.f32 %v1002_v4 }
 0x3c6   : > { %2143 = vrcp.f32 %v1017_v11 }
 0x3c7   : > { %v2134_v18 = vpop.eup %2133 }
 0x3c8   : > { %v1014_v13 = vpop.xlane.xlu1 %1013  ;;  %v2136_v8 = vpop.eup %2135 }
 0x3c9   : > { %2145 = vrcp.f32 %v1014_v13  ;;  %v1023_v21 = vpop.xlane.xlu0 %1022 }
 0x3ca   : > { %2147 = vrcp.f32 %v1023_v21 }
 0x3cb   : > { %v2138_v12 = vpop.eup %2137 }
 0x3cc   : > { %v2140_v29 = vpop.eup %2139 }
 0x3cd   : > { %v1020_v25 = vpop.xlane.xlu1 %1019  ;;  %v1029_v15 = vpop.xlane.xlu0 %1028 }
 0x3ce   : > { %2149 = vrcp.f32 %v1020_v25 }
 0x3cf   : > { %v2142_v30 = vpop.eup %2141  ;;  %2151 = vrcp.f32 %v1029_v15 }
 0x3d0   : > { %v2144_v53 = vpop.eup %2143 }
 0x3d1   : > { %v1026_v31 = vpop.xlane.xlu1 %1025 }
 0x3d2   : > { %2153 = vrcp.f32 %v1026_v31 }
 0x3d3   : > { %v2146_v49 = vpop.eup %2145 }
 0x3d4   : > { %v2148_v34 = vpop.eup %2147 }
 0x3d8   : > { %v2150_v35 = vpop.eup %2149 }
 0x3d9   : > { %v2152_v36 = vpop.eup %2151 }
 0x3dc   : > { %v2154_v39 = vpop.eup %2153 }
 0x3ef   : > { %v1859_v61 = vpop.f32.mrb[20].mxu0 }
 0x3f0   : > { %v1483_v62 = vmul.f32 %v2124_v58, %v1859_v61  ;;  %v1120_v63 = vpop.f32.mrb[21].mxu0 }
 0x3f1   : > { %v1482_v59 = vmul.f32 %v2126_v19, %v1120_v63 }
 0x3f2   : > { %1499 = vst.msk [vmem:[%s2704_s22 + $0x8] sm:$0xff] %vm410_vm1, %v1483_v62 }
 0x3f3   : > { %1498 = vst.msk [vmem:[%s2704_s22] sm:$0xff] %vm410_vm1, %v1482_v59 }
 0x3f7   : > { %v1862_v2 = vpop.f32.mrb[22].mxu0 }
 0x3f8   : > { %v1485_v3 = vmul.f32 %v2128_v1, %v1862_v2  ;;  %v1130_v9 = vpop.f32.mrb[23].mxu0 }
 0x3f9   : > { %v1484_v10 = vmul.f32 %v2130_v5, %v1130_v9 }
 0x3fa   : > { %1501 = vst.msk [vmem:[%s2704_s22 + $0x18] sm:$0xff] %vm410_vm1, %v1485_v3 }
 0x3fb   : > { %1500 = vst.msk [vmem:[%s2704_s22 + $0x10] sm:$0xff] %vm410_vm1, %v1484_v10 }
 0x402   : > { %v1873_v16 = vpop.f32.mrb[24].mxu0 }
 0x403   : > { %v1487_v20 = vmul.f32 %v2132_v14, %v1873_v16  ;;  %v1229_v7 = vpop.f32.mrb[25].mxu0 }
 0x404   : > { %v1486_v23 = vmul.f32 %v2134_v18, %v1229_v7  ;;  %v1887_v24 = vpop.f32.mrb[12].mxu1 }
 0x405   : > { %1503 = vst.msk [vmem:[%s2704_s22 + $0x28] sm:$0xff] %vm410_vm1, %v1487_v20  ;;  %v1491_v26 = vmul.f32 %v2136_v8, %v1887_v24  ;;  %v1338_v27 = vpop.f32.mrb[13].mxu1 }
 0x406   : > { %1502 = vst.msk [vmem:[%s2704_s22 + $0x20] sm:$0xff] %vm410_vm1, %v1486_v23  ;;  %v1490_v28 = vmul.f32 %v2138_v12, %v1338_v27 }
 0x407   : > { %1507 = vst.msk [vmem:[%s2704_s22 + $0x48] sm:$0xff] %vm410_vm1, %v1491_v26 }
 0x408   : > { %1506 = vst.msk [vmem:[%s2704_s22 + $0x40] sm:$0xff] %vm410_vm1, %v1490_v28 }
 0x40a   : > { %v1876_v17 = vpop.f32.mrb[26].mxu0 }
 0x40b   : > { %v1489_v51 = vmul.f32 %v2140_v29, %v1876_v17  ;;  %v1239_v52 = vpop.f32.mrb[27].mxu0 }
 0x40c   : > { %v1488_v47 = vmul.f32 %v2142_v30, %v1239_v52  ;;  %v1890_v48 = vpop.f32.mrb[14].mxu1 }
 0x40d   : > { %1505 = vst.msk [vmem:[%s2704_s22 + $0x38] sm:$0xff] %vm410_vm1, %v1489_v51  ;;  %v1493_v32 = vmul.f32 %v2144_v53, %v1890_v48  ;;  %v1348_v22 = vpop.f32.mrb[15].mxu1 }
 0x40e   : > { %1504 = vst.msk [vmem:[%s2704_s22 + $0x30] sm:$0xff] %vm410_vm1, %v1488_v47  ;;  %v1492_v33 = vmul.f32 %v2146_v49, %v1348_v22 }
 0x40f   : > { %1509 = vst.msk [vmem:[%s2704_s22 + $0x58] sm:$0xff] %vm410_vm1, %v1493_v32 }
 0x410   : > { %1508 = vst.msk [vmem:[%s2704_s22 + $0x50] sm:$0xff] %vm410_vm1, %v1492_v33 }
 0x417   : > { %v1901_v37 = vpop.f32.mrb[28].mxu0 }
 0x418   : > { %v1904_v38 = vpop.f32.mrb[16].mxu1  ;;  %v1495_v40 = vmul.f32 %v2148_v34, %v1901_v37  ;;  %v1447_v42 = vpop.f32.mrb[29].mxu0 }
 0x419   : > { %v1497_v41 = vmul.f32 %v2152_v36, %v1904_v38  ;;  %v1457_v43 = vpop.f32.mrb[17].mxu1  ;;  %v1494_v44 = vmul.f32 %v2150_v35, %v1447_v42 }
 0x41a   : > { %v1496_v45 = vmul.f32 %v2154_v39, %v1457_v43  ;;  %1511 = vst.msk [vmem:[%s2704_s22 + $0x68] sm:$0xff] %vm410_vm1, %v1495_v40 }
 0x41b   : > { %1513 = vst.msk [vmem:[%s2704_s22 + $0x78] sm:$0xff] %vm410_vm1, %v1497_v41  ;;  %1510 = vst.msk [vmem:[%s2704_s22 + $0x60] sm:$0xff] %vm410_vm1, %v1494_v44 }
 0x41c   : > { %1512 = vst.msk [vmem:[%s2704_s22 + $0x70] sm:$0xff] %vm410_vm1, %v1496_v45 }
 0x41d PF: > { %p13_p6 = scmp.ge.s32.totalorder %s2321_s20, 6   ;;  %s2768_s9 = smov %s2243_s10 }
 0x41e   : > { %s2769_s10 = smov %s2247_s11  ;;  %s2770_s11 = smov %s2350_s7 }
 0x41f   : > { %s2771_s12 = smov %s2321_s20  ;;  %15 = sbr.rel (!%p13_p6) target bundleno = 4 (0x4), region = 72 }
 0x426   :  { %1538 = vsyncpa [#allocation3], 1 }
 0x427   :  { %1540 = vsyncpa [#allocation3 + $0x1], 1 }
 0x428   :  { %1541 = vsyncpa [#allocation5], 1 }

</bundles_post_ra>
